<compile_context>
chip_gen: v7x
topology: tpu7x:2x2x1
jax: 0.10.0
libtpu: 0.0.40
codegen_flags: <defaults>
</compile_context>

<pallas_src>
import jax
import jax.numpy as jnp
from jax.experimental import pallas as pl
from jax.experimental.pallas import tpu as pltpu

IN_FEATURES = 10


def _termination_kernel(w_ref, b_ref, obs_ref, out_ref):
    """Per-tile body.

    w_ref   : (10,) f32 in SMEM   (scalar weight reads)
    b_ref   : (1,)  f32 in SMEM   (scalar bias)
    obs_ref : (10, TB//128, 128) f32 in VMEM  (features major, batch on 8x128 tiles)
    out_ref : (TB//128, 128)     f32 in VMEM  (fully dense output tile)
    """
    acc = jnp.zeros(out_ref.shape, dtype=jnp.float32)
    # 10 unrolled scalar-broadcast FMAs on the VPU; no MXU, no cross-lane reduce.
    for i in range(IN_FEATURES):
        acc = acc + w_ref[i] * obs_ref[i]
    out_ref[...] = jax.nn.sigmoid(acc + b_ref[0]).astype(out_ref.dtype)


def _termination_pallas(obs, weight_vec, bias_vec, *, tb):
    B, F = obs.shape
    assert F == IN_FEATURES

    # Keep tiles a multiple of 1024 (= 8 sublanes * 128 lanes of f32) and
    # don't over-pad tiny batches.
    b_round = ((B + 1023) // 1024) * 1024
    tb = max(1024, min(tb, b_round))
    tb = (tb // 1024) * 1024

    n_blocks = pl.cdiv(B, tb)
    b_pad = n_blocks * tb
    rows_per_block = tb // 128

    # Single XLA layout pass: batch onto the minor (sublane, lane) dims.
    obs_t = jnp.transpose(obs)                                # (F, B)
    if b_pad != B:
        obs_t = jnp.pad(obs_t, ((0, 0), (0, b_pad - B)))
    obs_t = obs_t.reshape(F, b_pad // 128, 128)               # (F, rows, 128)

    out = pl.pallas_call(
        _termination_kernel,
        out_shape=jax.ShapeDtypeStruct((b_pad // 128, 128), jnp.float32),
        grid=(n_blocks,),
        in_specs=[
            pl.BlockSpec(memory_space=pltpu.MemorySpace.SMEM),      # weights (10,)
            pl.BlockSpec(memory_space=pltpu.MemorySpace.SMEM),      # bias (1,)
            pl.BlockSpec((F, rows_per_block, 128), lambda i: (0, i, 0)),
        ],
        out_specs=pl.BlockSpec((rows_per_block, 128), lambda i: (i, 0)),
        compiler_params=pltpu.CompilerParams(
            dimension_semantics=("parallel",)),
    )(weight_vec, bias_vec, obs_t)

    # (b_pad//128, 128) row-major flatten == original batch order.
    return out.reshape(-1)[:B]


def dummy_termination_forward(obs, weight, bias, *, tb=8192,
                              min_pallas_batch=1024, force_pallas=False):
    """sigmoid(Linear(10 -> 1)(obs)).reshape(-1)

    obs    : [B, 10] f32
    weight : [1, 10] f32 (PyTorch nn.Linear layout; [10] / [10,1] also accepted)
    bias   : [1] f32
    """
    B, F = obs.shape
    assert F == IN_FEATURES
    obs = obs.astype(jnp.float32)
    w = weight.reshape(IN_FEATURES).astype(jnp.float32)
    b = bias.reshape(1).astype(jnp.float32)

    if not force_pallas and B < min_pallas_batch:
        # Tiny batches: a single fused XLA op beats fixed pallas_call overhead.
        return jax.nn.sigmoid(obs @ w[:, None] + b).reshape(-1)

    return _termination_pallas(obs, w, b, tb=tb)


if __name__ == "__main__":
    key = jax.random.PRNGKey(0)
    k_obs, k_w, k_b, k_obs2 = jax.random.split(key, 4)

    F = IN_FEATURES
    # Deterministic init mimicking torch.nn.Linear(10, 1):
    # U(-1/sqrt(in_features), 1/sqrt(in_features)); weight in torch [out, in] layout.
    bound = 1.0 / jnp.sqrt(jnp.float32(F))
    weight = jax.random.uniform(k_w, (1, F), jnp.float32, -bound, bound)
    bias = jax.random.uniform(k_b, (1,), jnp.float32, -bound, bound)

    def ref(o):
        return jax.nn.sigmoid(o @ weight.reshape(F, 1) + bias).reshape(-1)

    # 1) Small batch (module's typical test size): dispatcher -> fused XLA path.
    obs_small = jax.random.normal(k_obs, (8, F), dtype=jnp.float32)
    out_small = jax.block_until_ready(
        dummy_termination_forward(obs_small, weight, bias))
    assert out_small.shape == (8,)
    assert jnp.allclose(out_small, ref(obs_small), atol=1e-5, rtol=1e-5)

    # 2) Same small batch, forced through the Pallas kernel (padded to 1 tile).
    out_small_pl = jax.block_until_ready(
        dummy_termination_forward(obs_small, weight, bias, force_pallas=True))
    assert out_small_pl.shape == (8,)
    assert jnp.allclose(out_small_pl, ref(obs_small), atol=1e-5, rtol=1e-5)

    # 3) Larger batch: Pallas path with a 2-step parallel grid (tb=1024).
    obs_big = jax.random.normal(k_obs2, (2048, F), dtype=jnp.float32)
    out_big = jax.block_until_ready(
        dummy_termination_forward(obs_big, weight, bias, tb=1024))
    assert out_big.shape == (2048,)
    assert jnp.allclose(out_big, ref(obs_big), atol=1e-5, rtol=1e-5)

    print("KERNEL_OK")
</pallas_src>

<mosaic_0001>
module attributes {stable_mosaic.version = 11 : i64} {
  func.func @_termination_kernel(%arg0: i32, %arg1: memref<10xf32, #tpu.memory_space<smem>>, %arg2: memref<1xf32, #tpu.memory_space<smem>>, %arg3: memref<10x8x128xf32, #tpu.memory_space<vmem>>, %arg4: memref<8x128xf32, #tpu.memory_space<vmem>>) attributes {dimension_semantics = [#tpu.dimension_semantics<parallel>], iteration_bounds = array<i64: 1>, scalar_prefetch = 0 : i64, scratch_operands = 0 : i64, tpu.core_type = #tpu.core_type<tc>, window_params = [{transform_indices = @transform_0, window_bounds = array<i64: 10>}, {transform_indices = @transform_1, window_bounds = array<i64: 1>}, {transform_indices = @transform_2, window_bounds = array<i64: 10, 8, 128>}, {transform_indices = @transform_3, window_bounds = array<i64: 8, 128>}]} {
    %cst = arith.constant 0.000000e+00 : f32
    %0 = vector.broadcast %cst : f32 to vector<8x128xf32>
    %c0 = arith.constant 0 : index
    %1 = memref.load %arg1[%c0] : memref<10xf32, #tpu.memory_space<smem>>
    %c0_0 = arith.constant 0 : index
    %c0_1 = arith.constant 0 : index
    %c0_2 = arith.constant 0 : index
    %2 = vector.load %arg3[%c0_0, %c0_1, %c0_2] : memref<10x8x128xf32, #tpu.memory_space<vmem>>, vector<1x8x128xf32>
    %3 = vector.shape_cast %2 : vector<1x8x128xf32> to vector<8x128xf32>
    %4 = vector.broadcast %1 : f32 to vector<8x128xf32>
    %5 = arith.mulf %4, %3 : vector<8x128xf32>
    %6 = arith.addf %0, %5 : vector<8x128xf32>
    %c1 = arith.constant 1 : index
    %7 = memref.load %arg1[%c1] : memref<10xf32, #tpu.memory_space<smem>>
    %c1_3 = arith.constant 1 : index
    %c0_4 = arith.constant 0 : index
    %c0_5 = arith.constant 0 : index
    %8 = vector.load %arg3[%c1_3, %c0_4, %c0_5] : memref<10x8x128xf32, #tpu.memory_space<vmem>>, vector<1x8x128xf32>
    %9 = vector.shape_cast %8 : vector<1x8x128xf32> to vector<8x128xf32>
    %10 = vector.broadcast %7 : f32 to vector<8x128xf32>
    %11 = arith.mulf %10, %9 : vector<8x128xf32>
    %12 = arith.addf %6, %11 : vector<8x128xf32>
    %c2 = arith.constant 2 : index
    %13 = memref.load %arg1[%c2] : memref<10xf32, #tpu.memory_space<smem>>
    %c2_6 = arith.constant 2 : index
    %c0_7 = arith.constant 0 : index
    %c0_8 = arith.constant 0 : index
    %14 = vector.load %arg3[%c2_6, %c0_7, %c0_8] : memref<10x8x128xf32, #tpu.memory_space<vmem>>, vector<1x8x128xf32>
    %15 = vector.shape_cast %14 : vector<1x8x128xf32> to vector<8x128xf32>
    %16 = vector.broadcast %13 : f32 to vector<8x128xf32>
    %17 = arith.mulf %16, %15 : vector<8x128xf32>
    %18 = arith.addf %12, %17 : vector<8x128xf32>
    %c3 = arith.constant 3 : index
    %19 = memref.load %arg1[%c3] : memref<10xf32, #tpu.memory_space<smem>>
    %c3_9 = arith.constant 3 : index
    %c0_10 = arith.constant 0 : index
    %c0_11 = arith.constant 0 : index
    %20 = vector.load %arg3[%c3_9, %c0_10, %c0_11] : memref<10x8x128xf32, #tpu.memory_space<vmem>>, vector<1x8x128xf32>
    %21 = vector.shape_cast %20 : vector<1x8x128xf32> to vector<8x128xf32>
    %22 = vector.broadcast %19 : f32 to vector<8x128xf32>
    %23 = arith.mulf %22, %21 : vector<8x128xf32>
    %24 = arith.addf %18, %23 : vector<8x128xf32>
    %c4 = arith.constant 4 : index
    %25 = memref.load %arg1[%c4] : memref<10xf32, #tpu.memory_space<smem>>
    %c4_12 = arith.constant 4 : index
    %c0_13 = arith.constant 0 : index
    %c0_14 = arith.constant 0 : index
    %26 = vector.load %arg3[%c4_12, %c0_13, %c0_14] : memref<10x8x128xf32, #tpu.memory_space<vmem>>, vector<1x8x128xf32>
    %27 = vector.shape_cast %26 : vector<1x8x128xf32> to vector<8x128xf32>
    %28 = vector.broadcast %25 : f32 to vector<8x128xf32>
    %29 = arith.mulf %28, %27 : vector<8x128xf32>
    %30 = arith.addf %24, %29 : vector<8x128xf32>
    %c5 = arith.constant 5 : index
    %31 = memref.load %arg1[%c5] : memref<10xf32, #tpu.memory_space<smem>>
    %c5_15 = arith.constant 5 : index
    %c0_16 = arith.constant 0 : index
    %c0_17 = arith.constant 0 : index
    %32 = vector.load %arg3[%c5_15, %c0_16, %c0_17] : memref<10x8x128xf32, #tpu.memory_space<vmem>>, vector<1x8x128xf32>
    %33 = vector.shape_cast %32 : vector<1x8x128xf32> to vector<8x128xf32>
    %34 = vector.broadcast %31 : f32 to vector<8x128xf32>
    %35 = arith.mulf %34, %33 : vector<8x128xf32>
    %36 = arith.addf %30, %35 : vector<8x128xf32>
    %c6 = arith.constant 6 : index
    %37 = memref.load %arg1[%c6] : memref<10xf32, #tpu.memory_space<smem>>
    %c6_18 = arith.constant 6 : index
    %c0_19 = arith.constant 0 : index
    %c0_20 = arith.constant 0 : index
    %38 = vector.load %arg3[%c6_18, %c0_19, %c0_20] : memref<10x8x128xf32, #tpu.memory_space<vmem>>, vector<1x8x128xf32>
    %39 = vector.shape_cast %38 : vector<1x8x128xf32> to vector<8x128xf32>
    %40 = vector.broadcast %37 : f32 to vector<8x128xf32>
    %41 = arith.mulf %40, %39 : vector<8x128xf32>
    %42 = arith.addf %36, %41 : vector<8x128xf32>
    %c7 = arith.constant 7 : index
    %43 = memref.load %arg1[%c7] : memref<10xf32, #tpu.memory_space<smem>>
    %c7_21 = arith.constant 7 : index
    %c0_22 = arith.constant 0 : index
    %c0_23 = arith.constant 0 : index
    %44 = vector.load %arg3[%c7_21, %c0_22, %c0_23] : memref<10x8x128xf32, #tpu.memory_space<vmem>>, vector<1x8x128xf32>
    %45 = vector.shape_cast %44 : vector<1x8x128xf32> to vector<8x128xf32>
    %46 = vector.broadcast %43 : f32 to vector<8x128xf32>
    %47 = arith.mulf %46, %45 : vector<8x128xf32>
    %48 = arith.addf %42, %47 : vector<8x128xf32>
    %c8 = arith.constant 8 : index
    %49 = memref.load %arg1[%c8] : memref<10xf32, #tpu.memory_space<smem>>
    %c8_24 = arith.constant 8 : index
    %c0_25 = arith.constant 0 : index
    %c0_26 = arith.constant 0 : index
    %50 = vector.load %arg3[%c8_24, %c0_25, %c0_26] : memref<10x8x128xf32, #tpu.memory_space<vmem>>, vector<1x8x128xf32>
    %51 = vector.shape_cast %50 : vector<1x8x128xf32> to vector<8x128xf32>
    %52 = vector.broadcast %49 : f32 to vector<8x128xf32>
    %53 = arith.mulf %52, %51 : vector<8x128xf32>
    %54 = arith.addf %48, %53 : vector<8x128xf32>
    %c9 = arith.constant 9 : index
    %55 = memref.load %arg1[%c9] : memref<10xf32, #tpu.memory_space<smem>>
    %c9_27 = arith.constant 9 : index
    %c0_28 = arith.constant 0 : index
    %c0_29 = arith.constant 0 : index
    %56 = vector.load %arg3[%c9_27, %c0_28, %c0_29] : memref<10x8x128xf32, #tpu.memory_space<vmem>>, vector<1x8x128xf32>
    %57 = vector.shape_cast %56 : vector<1x8x128xf32> to vector<8x128xf32>
    %58 = vector.broadcast %55 : f32 to vector<8x128xf32>
    %59 = arith.mulf %58, %57 : vector<8x128xf32>
    %60 = arith.addf %54, %59 : vector<8x128xf32>
    %c0_30 = arith.constant 0 : index
    %61 = memref.load %arg2[%c0_30] : memref<1xf32, #tpu.memory_space<smem>>
    %62 = vector.broadcast %61 : f32 to vector<8x128xf32>
    %63 = arith.addf %60, %62 : vector<8x128xf32>
    %64 = arith.negf %63 : vector<8x128xf32>
    %65 = math.exp %64 : vector<8x128xf32>
    %cst_31 = arith.constant 1.000000e+00 : f32
    %66 = vector.broadcast %cst_31 : f32 to vector<8x128xf32>
    %67 = arith.addf %66, %65 : vector<8x128xf32>
    %68 = arith.divf %66, %67 : vector<8x128xf32>
    %c0_32 = arith.constant 0 : index
    %c0_33 = arith.constant 0 : index
    %69 = vector.load %arg4[%c0_32, %c0_33] : memref<8x128xf32, #tpu.memory_space<vmem>>, vector<8x128xf32>
    tpu.vector_store %arg4[%c0_32, %c0_33], %68 {strides = array<i32>} : memref<8x128xf32, #tpu.memory_space<vmem>>, vector<8x128xf32>,
    return
  }
  func.func @transform_0(%arg0: i32) -> i32 {
    %c0_i32 = arith.constant 0 : i32
    %c0_i32_0 = arith.constant 0 : i32
    return %c0_i32 : i32
  }
  func.func @transform_1(%arg0: i32) -> i32 {
    %c0_i32 = arith.constant 0 : i32
    %c0_i32_0 = arith.constant 0 : i32
    return %c0_i32 : i32
  }
  func.func @transform_2(%arg0: i32) -> (i32, i32, i32) {
    %c0_i32 = arith.constant 0 : i32
    %c0_i32_0 = arith.constant 0 : i32
    %c0_i32_1 = arith.constant 0 : i32
    return %c0_i32, %arg0, %c0_i32_0 : i32, i32, i32
  }
  func.func @transform_3(%arg0: i32) -> (i32, i32) {
    %c0_i32 = arith.constant 0 : i32
    %c0_i32_0 = arith.constant 0 : i32
    return %arg0, %c0_i32 : i32, i32
  }
}

</mosaic_0001>

<bundles_post_ra>
// kernel: tpu_custom_call.1
= control target key start
LH: loop header
LB: loop body
LE: loop exit
PB: predicated region body
PF: predicated region fallthrough
CT: control target
= control target key end

     0   :  { %9 = vsyncpa [#allocation6], 0  ;;  %s264_s0 = inlined_call_operand.vmem [shape: f32[10], index: 0, kind: input, shape index: {}]   ;;  %s265_s1 = inlined_call_operand.<no memory space> [shape: f32[1], index: 1, kind: input, shape index: {}]   ;;  %s266_s2 = inlined_call_operand.hbm [shape: f32[10,8,128], index: 2, kind: input, shape index: {}]   ;;  %s267_s3 = inlined_call_operand.hbm [shape: f32[8,128], index: 3, kind: output, shape index: {}]  }
   0x1   :  { %10 = vsyncpa [#allocation4], 0 }
   0x2   :  { %11 = vsyncpa [#allocation5], 0  ;;  %s18_s14 = sshll.u32 %s264_s0, 4  ;;  %s19_s14 = int_to_ptr.vmem [resolvable:$true] %s18_s14 }
   0x3   :  { %s147_s15 = scalar_lea.vmem %s19_s14, 16  ;;  %p152_p1 = scmp.lt.s32.totalorder %s19_s14, %s19_s14 }
   0x4   :  { %p148_p0 = scmp.ne.s32.totalorder %s19_s14, %s147_s15  ;;  %p153_p2 = scmp.lt.s32.totalorder %s147_s15, %s147_s15 }
   0x6   :  { %p154_p3 = por %p153_p2, %p152_p1 }
   0x8   :  { %p155_p4 = pnand %p154_p3, %p148_p0 }
   0xa   :  { %158 = shalt.err (!%p155_p4)
}
   0xb   :  { %s209_s16 = smov [#allocation3]   ;;  %s210_s17 = smov [#allocation7]  }
   0xc   :  { %21 = dma.vmem_to_smem %s19_s14, 16, %s209_s16, [#allocation6]  }
   0xd   :  { %s29_s18 = sshll.u32 %s210_s17, 4  ;;  %s159_s21 = scalar_lea.hbm %s266_s2, 1280  ;;  %s30_s18 = int_to_ptr.vmem [resolvable:$true] %s29_s18 }
   0xe   :  { %p160_p5 = scmp.ne.s32.totalorder %s266_s2, %s159_s21  ;;  %p163_p6 = scmp.lt.u32.totalorder %s159_s21, %s266_s2 }
  0x10   :  { %p165_p7 = pnand %p163_p6, %p160_p5 }
  0x12   :  { %168 = shalt.err (!%p165_p7)
}
  0x13   :  { %s169_s25 = scalar_lea.vmem %s30_s18, 1280  ;;  %p174_p9 = scmp.lt.s32.totalorder %s30_s18, %s30_s18 }
  0x14   :  { %p170_p8 = scmp.ne.s32.totalorder %s30_s18, %s169_s25  ;;  %p175_p10 = scmp.lt.s32.totalorder %s169_s25, %s169_s25 }
  0x16   :  { %p176_p11 = por %p175_p10, %p174_p9 }
  0x18   :  { %p177_p12 = pnand %p176_p11, %p170_p8 }
  0x1a   :  { %180 = shalt.err (!%p177_p12)
}
  0x1b   :  { %s211_s26 = smov 128   ;;  %s212_s27 = smov 8  }
  0x1c   :  { %35 = dma.hbm_to_vmem [thread:$0]  %s266_s2, 1280, %s30_s18, [#allocation4], %s211_s26, %s211_s26, %s212_s27  }
  0x1d   :  { %203 = dma.done.wait [#allocation6], 16  }
  0x1e   :  { %204 = vsyncadd [#allocation6], 4294967280 }
  0x1f   :  { %205 = dma.done.wait [#allocation4], 1280  }
  0x20   :  { %206 = vsyncadd [#allocation4], 4294966016 }
  0x21   :  { %42 = sfence }
  0x22   :  { %s43_s30 = sld [smem:[#allocation3]]  ;;  %s128_s4 = sld [smem:[#allocation3 + $0x1]]  ;;  %v44_v0 = vld [vmem:[#allocation7] sm:$0xff]  ;;  %v50_v1 = vld [vmem:[#allocation7 + $0x8] sm:$0xff]  ;;  %v56_v2 = vld [vmem:[#allocation7 + $0x10] sm:$0xff]  ;;  %v103_v38 = vstv %s265_s1 }
  0x23   :  { %s129_s5 = sld [smem:[#allocation3 + $0x2]]  ;;  %s130_s6 = sld [smem:[#allocation3 + $0x3]]  ;;  %v62_v5 = vld [vmem:[#allocation7 + $0x18] sm:$0xff]  ;;  %v68_v11 = vld [vmem:[#allocation7 + $0x20] sm:$0xff]  ;;  %v74_v15 = vld [vmem:[#allocation7 + $0x28] sm:$0xff] }
  0x24   :  { %s131_s7 = sld [smem:[#allocation3 + $0x4]]  ;;  %s132_s8 = sld [smem:[#allocation3 + $0x5]]  ;;  %v80_v19 = vld [vmem:[#allocation7 + $0x30] sm:$0xff]  ;;  %v86_v23 = vld [vmem:[#allocation7 + $0x38] sm:$0xff]  ;;  %v92_v27 = vld [vmem:[#allocation7 + $0x40] sm:$0xff] }
  0x25   :  { %s133_s9 = sld [smem:[#allocation3 + $0x6]]  ;;  %s134_s10 = sld [smem:[#allocation3 + $0x7]]  ;;  %v98_v31 = vld [vmem:[#allocation7 + $0x48] sm:$0xff] }
  0x26   :  { %s135_s2 = sld [smem:[#allocation3 + $0x8]]  ;;  %s136_s11 = sld [smem:[#allocation3 + $0x9]] }
  0x27   :  { %s213_s14 = smov [#allocation8]  }
  0x28   :  { %v45_v3 = vstv %s43_s30  ;;  %v51_v4 = vstv %s128_s4  ;;  %s118_s15 = sshll.u32 %s213_s14, 4  ;;  %s119_s15 = int_to_ptr.vmem [resolvable:$true] %s118_s15 }
  0x29   :  { %v46_v6 = vmul.f32 %v45_v3, %v44_v0  ;;  %v52_v7 = vmul.f32 %v51_v4, %v50_v1  ;;  %v57_v8 = vstv %s129_s5  ;;  %v63_v9 = vstv %s130_s6  ;;  %s181_s16 = scalar_lea.vmem %s119_s15, 128  ;;  %p186_p0 = scmp.lt.s32.totalorder %s119_s15, %s119_s15 }
  0x2a   :  { %v58_v10 = vmul.f32 %v57_v8, %v56_v2  ;;  %v69_v12 = vstv %s131_s7  ;;  %v64_v14 = vmul.f32 %v63_v9, %v62_v5  ;;  %v75_v16 = vstv %s132_s8  ;;  %p182_p13 = scmp.ne.s32.totalorder %s119_s15, %s181_s16  ;;  %p187_p1 = scmp.lt.s32.totalorder %s181_s16, %s181_s16 }
  0x2b   :  { %v53_v13 = vadd.f32 %v52_v7, %v46_v6  ;;  %v70_v18 = vmul.f32 %v69_v12, %v68_v11  ;;  %v81_v20 = vstv %s133_s9  ;;  %v76_v22 = vmul.f32 %v75_v16, %v74_v15 }
  0x2c   :  { %v87_v24 = vstv %s134_s10  ;;  %v82_v26 = vmul.f32 %v81_v20, %v80_v19  ;;  %v93_v28 = vstv %s135_s2  ;;  %v99_v32 = vstv %s136_s11  ;;  %p188_p2 = por %p187_p1, %p186_p0 }
  0x2d   :  { %v59_v17 = vadd.f32 %v58_v10, %v53_v13  ;;  %v88_v30 = vmul.f32 %v87_v24, %v86_v23  ;;  %v94_v34 = vmul.f32 %v93_v28, %v92_v27  ;;  %v100_v36 = vmul.f32 %v99_v32, %v98_v31 }
  0x2e   :  { %p189_p3 = pnand %p188_p2, %p182_p13 }
  0x2f   :  { %v65_v21 = vadd.f32 %v64_v14, %v59_v17 }
  0x31   :  { %v71_v25 = vadd.f32 %v70_v18, %v65_v21 }
  0x33   :  { %v77_v29 = vadd.f32 %v76_v22, %v71_v25 }
  0x35   :  { %v83_v33 = vadd.f32 %v82_v26, %v77_v29 }
  0x37   :  { %v89_v35 = vadd.f32 %v88_v30, %v83_v33 }
  0x39   :  { %v95_v37 = vadd.f32 %v94_v34, %v89_v35 }
  0x3b   :  { %v101_v39 = vadd.f32 %v100_v36, %v95_v37 }
  0x3d   :  { %v104_v40 = vadd.f32 %v103_v38, %v101_v39 }
  0x3f   :  { %v137_v41 = vmul.f32 -1.442695, %v104_v40 }
  0x41   :  { %143 = vpow2.f32 %v137_v41 }
  0x4b   :  { %v144_v42 = vpop.eup %143 }
  0x4c   :  { %v108_v43 = vadd.f32 1.0, %v144_v42 }
  0x4e   :  { %145 = vrcp.f32 %v108_v43 }
  0x58   :  { %v146_v44 = vpop.eup %145 }
  0x59   :  { %111 = vst [vmem:[#allocation8] sm:$0xff] %v146_v44 }
  0x5a   :  { %192 = shalt.err (!%p189_p3)
}
  0x5b   :  { %s193_s18 = scalar_lea.hbm %s267_s3, 128 }
  0x5c   :  { %p194_p4 = scmp.ne.s32.totalorder %s267_s3, %s193_s18  ;;  %p197_p5 = scmp.lt.u32.totalorder %s193_s18, %s267_s3 }
  0x5e   :  { %p199_p6 = pnand %p197_p5, %p194_p4 }
  0x60   :  { %202 = shalt.err (!%p199_p6)
}
  0x61   :  { %121 = dma.vmem_to_hbm [thread:$0]  %s119_s15, 128, %s267_s3, [#allocation5]  }
  0x62   :  { %207 = dma.done.wait [#allocation5], 128  }
  0x63   :  { %208 = vsyncadd [#allocation5], 4294967168 }
  0x64   :  { %125 = vsyncpa [#allocation4], 1 }
  0x65   :  { %126 = vsyncpa [#allocation5], 1 }
  0x66   :  { %127 = vsyncpa [#allocation6], 1 }

</bundles_post_ra>
